<compile_context>
chip_gen: v5e
topology: v5e:2x2
jax: 0.10.0
libtpu: 0.0.40
codegen_flags: <defaults>
</compile_context>

<pallas_src>
import functools

import jax
import jax.numpy as jnp
from jax.experimental import pallas as pl
from jax.experimental.pallas import tpu as pltpu

NEG_SLOPE_GIN = 0.01   # activation_resolver('LeakyReLU') default inside GIN
NEG_SLOPE_FC = 0.01    # regresor_GIN LeakyReLU_slope default

# Lane-dense padded sizes (vreg lane width = 128).
F_PAD = 128    # num_features (4)  -> 128
H_PAD = 128    # hidden_dim   (5)  -> 128
HL_PAD = 128   # hidden_lstm  (7)  -> 128
C_PAD = 128    # out_channels (6)  -> 128
O_PAD = 128    # final output (1)  -> 128
B_SUB = 8      # sublane granularity (target band / batch padding)


def _leaky(x, slope):
    return jnp.where(x > 0, x, slope * x)


def _round_up(v, m):
    return -(-v // m) * m


def _conv_vmem_limit():
    # Derive the scoped-VMEM budget from the actual part (64 MiB on v7x,
    # 128 MiB on v5e/v6e); leave ~30% headroom for the compiler.
    cap = 64 * 1024 * 1024
    try:
        info = pltpu.get_tpu_info()
        cap = int(getattr(info, "vmem_capacity_bytes", cap))
    except Exception:
        pass
    return int(min(int(cap * 0.7), 100 * 1024 * 1024))


# ---------------------------------------------------------------------------
# Phase 1: all GIN layers fused, one grid step per graph.
#   z_{l+1} = leaky( leaky( ((adj+I) @ z_l) @ W1_l + b1_l ) @ W2_l + b2_l )
# Only the 8-row target band of every layer is written back; the last layer is
# only computed for that band.
# ---------------------------------------------------------------------------
def _gin_conv_kernel(adj_ref, h_ref, w1s_ref, b1s_ref, w2s_ref, b2s_ref,
                     band_ref, *, num_layers, band_start):
    f32 = jnp.float32
    bf16 = jnp.bfloat16
    adj = adj_ref[...]                    # (n_pad, n_pad) bf16, diag already +1 (eps = 0)
    z = h_ref[...]                        # (n_pad, F_PAD) bf16 node features
    for l in range(num_layers):
        last = l == num_layers - 1
        # The last layer's output only feeds the JK head at the target node, so
        # compute just the 8-row aligned band containing the target row.
        rows = adj[band_start:band_start + B_SUB, :] if last else adj
        agg = jnp.dot(rows, z, preferred_element_type=f32)       # bf16 MXU, f32 acc
        y = jnp.dot(agg, w1s_ref[l], preferred_element_type=f32) + b1s_ref[l]
        y = _leaky(y, NEG_SLOPE_GIN)                             # MLP act (act_first, norm=None)
        y = jnp.dot(y, w2s_ref[l], preferred_element_type=f32) + b2s_ref[l]
        y = _leaky(y, NEG_SLOPE_GIN)                             # BasicGNN act (act_first=True)
        # dropout -> identity (inference)
        if last:
            band_ref[l] = y                                      # (8, H_PAD)
        else:
            band_ref[l] = y[band_start:band_start + B_SUB, :]    # target band of this layer
            z = y.astype(bf16)                                   # bf16 re-ingestion for next agg


def _gin_conv_call(adj_bf16, h_bf16, w1s, b1s, w2s, b2s, *, num_layers, band_start):
    batch, n_pad, _ = adj_bf16.shape
    return pl.pallas_call(
        functools.partial(_gin_conv_kernel,
                          num_layers=num_layers, band_start=band_start),
        out_shape=jax.ShapeDtypeStruct((batch, num_layers, B_SUB, H_PAD), jnp.float32),
        grid_spec=pltpu.PrefetchScalarGridSpec(
            num_scalar_prefetch=0,
            grid=(batch,),
            in_specs=[
                pl.BlockSpec((None, n_pad, n_pad), lambda g: (g, 0, 0)),   # adj block (bf16)
                pl.BlockSpec((None, n_pad, F_PAD), lambda g: (g, 0, 0)),   # features (bf16)
                pl.BlockSpec((num_layers, F_PAD, H_PAD), lambda g: (0, 0, 0)),
                pl.BlockSpec((num_layers, 1, H_PAD), lambda g: (0, 0, 0)),
                pl.BlockSpec((num_layers, H_PAD, H_PAD), lambda g: (0, 0, 0)),
                pl.BlockSpec((num_layers, 1, H_PAD), lambda g: (0, 0, 0)),
            ],
            out_specs=pl.BlockSpec((None, num_layers, B_SUB, H_PAD),
                                   lambda g: (g, 0, 0, 0)),
        ),
        compiler_params=pltpu.CompilerParams(
            dimension_semantics=("parallel",),      # graphs are independent
            vmem_limit_bytes=_conv_vmem_limit(),
        ),
    )(adj_bf16, h_bf16, w1s, b1s, w2s, b2s)
    # TODO(synk): for graphs whose (n_pad, n_pad) bf16 block exceeds the VMEM
    # budget, row-tile the per-graph aggregation (inner grid axis) instead of
    # keeping the whole block resident.


# ---------------------------------------------------------------------------
# Phase 2: JK-LSTM + attention + projections + FC head, on target rows only.
# ---------------------------------------------------------------------------
def _jk_head_kernel(x0_ref, x1_ref, x2_ref,
                    wih_f_ref, whh_f_ref, bf_ref,
                    wih_b_ref, whh_b_ref, bb_ref,
                    watt_ref, batt_ref,
                    wlin_ref, blin_ref, wfc_ref, bfc_ref,
                    out_ref, *, hl_pad):
    f32 = jnp.float32
    xs = [x0_ref[...], x1_ref[...], x2_ref[...]]   # (B_PAD, H_PAD) target rows per layer
    nrows = xs[0].shape[0]
    nsteps = len(xs)

    def lstm_direction(seq, wih_ref, whh_ref, b_ref):
        wih = wih_ref[...]    # (H_PAD, 4*HL_PAD), each gate in its own 128-lane block
        whh = whh_ref[...]    # (HL_PAD, 4*HL_PAD)
        bias = b_ref[...]     # (1, 4*HL_PAD): bih + bhh pre-summed
        # Hoisted input->gates matmul: one MXU push for all time steps; only the
        # recurrent h @ Whh stays inside the loop.
        xg = jnp.dot(jnp.concatenate(seq, axis=0), wih,
                     preferred_element_type=f32) + bias            # (T*B, 4*HL_PAD)
        h = jnp.zeros((nrows, hl_pad), f32)
        c = jnp.zeros((nrows, hl_pad), f32)
        outs = []
        for t in range(nsteps):
            gates = xg[t * nrows:(t + 1) * nrows] + jnp.dot(
                h, whh, preferred_element_type=f32)
            # gate slices fall on 128-lane boundaries (PyTorch order i, f, g, o)
            i_g = jax.nn.sigmoid(gates[:, 0 * hl_pad:1 * hl_pad])
            f_g = jax.nn.sigmoid(gates[:, 1 * hl_pad:2 * hl_pad])
            g_g = jnp.tanh(gates[:, 2 * hl_pad:3 * hl_pad])
            o_g = jax.nn.sigmoid(gates[:, 3 * hl_pad:4 * hl_pad])
            c = f_g * c + i_g * g_g
            h = o_g * jnp.tanh(c)
            outs.append(h)
        return outs

    outs_f = lstm_direction(xs, wih_f_ref, whh_f_ref, bf_ref)
    outs_b = lstm_direction(xs[::-1], wih_b_ref, whh_b_ref, bb_ref)[::-1]

    # JK attention: Linear(concat(h_fwd, h_bwd)) -> softmax over the layers.
    watt = watt_ref[...]      # (1, 2*HL_PAD) row vector (fwd half | bwd half)
    batt = batt_ref[...]      # (1, 1)
    logits = []
    for t in range(nsteps):
        cat = jnp.concatenate([outs_f[t], outs_b[t]], axis=-1)
        logits.append(jnp.sum(cat * watt, axis=-1, keepdims=True) + batt)
    m = functools.reduce(jnp.maximum, logits)
    e = [jnp.exp(l - m) for l in logits]
    denom = functools.reduce(jnp.add, e)
    jk = functools.reduce(jnp.add, [e[t] * xs[t] for t in range(nsteps)]) / denom

    # GIN output projection (hidden -> out_channels), LeakyReLU, FC1 head.
    y = jnp.dot(jk, wlin_ref[...], preferred_element_type=f32) + blin_ref[...]
    y = _leaky(y, NEG_SLOPE_FC)
    out_ref[...] = jnp.dot(y, wfc_ref[...], preferred_element_type=f32) + bfc_ref[...]


def _jk_head_call(xt, packed):
    nrows = xt[0].shape[0]
    args = [xt[0], xt[1], xt[2],
            packed["lstm"][0]["Wih"], packed["lstm"][0]["Whh"], packed["lstm"][0]["B"],
            packed["lstm"][1]["Wih"], packed["lstm"][1]["Whh"], packed["lstm"][1]["B"],
            packed["watt"], packed["batt"],
            packed["wlin"], packed["blin"], packed["wfc"], packed["bfc"]]
    vmem = pl.BlockSpec(memory_space=pltpu.MemorySpace.VMEM)
    return pl.pallas_call(
        functools.partial(_jk_head_kernel, hl_pad=HL_PAD),
        out_shape=jax.ShapeDtypeStruct((nrows, O_PAD), jnp.float32),
        in_specs=[vmem] * len(args),
        out_specs=vmem,
    )(*args)


# ---------------------------------------------------------------------------
# Forward wrapper
# ---------------------------------------------------------------------------
def regresor_gin_forward(x, edge_index, packed, *, batch_size, n_nodes,
                         num_features, target_node_idx):
    num_layers = packed["w1s"].shape[0]
    assert num_layers == 3, "JK head kernel assumes num_layers == 3"
    f32 = jnp.float32
    n_pad = max(_round_up(n_nodes, B_SUB), B_SUB)

    # Per-graph node features, zero padded to (n_pad, F_PAD); bf16 for MXU
    # ingestion (padded lanes / rows stay exactly 0 through the pipeline).
    h = jnp.zeros((batch_size, n_pad, F_PAD), f32)
    h = h.at[:, :n_nodes, :num_features].set(
        x.reshape(batch_size, n_nodes, num_features))
    h = h.astype(jnp.bfloat16)

    # Block-diagonal adjacency, one (n_pad, n_pad) block per graph, built at
    # per-graph size (no O(N_total^2) intermediate).  adj[g, dst, src] = edge
    # count, plus +1 on the diagonal (GINConv eps=0 self term folded into the
    # aggregation matmul).  bf16 edge counts are exact up to 256; batched
    # graphs are assumed independent (no cross-graph edges), as in PyG.
    g_of_edge = edge_index[0] // n_nodes
    src_loc = edge_index[0] % n_nodes
    dst_loc = edge_index[1] % n_nodes
    adj = jnp.zeros((batch_size, n_pad, n_pad), f32)
    adj = adj.at[g_of_edge, dst_loc, src_loc].add(1.0)
    diag = jnp.arange(n_nodes)
    adj = adj.at[:, diag, diag].add(1.0)
    adj = adj.astype(jnp.bfloat16)

    # Fused 3-layer conv phase; only the 8-row band containing the target node
    # is written back per layer (and the last layer only computes that band).
    band_start = (target_node_idx // B_SUB) * B_SUB
    bands = _gin_conv_call(adj, h, packed["w1s"], packed["b1s"],
                           packed["w2s"], packed["b2s"],
                           num_layers=num_layers, band_start=band_start)

    # Gather the target row of every layer, pad batch to the sublane width.
    t_loc = target_node_idx - band_start
    b_pad = max(B_SUB, _round_up(batch_size, B_SUB))
    xt = [jnp.zeros((b_pad, H_PAD), f32).at[:batch_size].set(bands[:, l, t_loc, :])
          for l in range(num_layers)]

    out = _jk_head_call(xt, packed)
    return out[:batch_size, 0:1].squeeze()     # matches x[:, idx, :].squeeze()


# ---------------------------------------------------------------------------
# Parameter construction: true (PyTorch-sized) params, then lane-dense packing.
# ---------------------------------------------------------------------------
def _init_true_params(key, *, num_features, hidden_dim, out_channels,
                      num_layers, hidden_lstm):
    keys = iter(jax.random.split(key, 64))

    def w(shape, scale=0.2):
        return (scale * jax.random.normal(next(keys), shape)).astype(jnp.float32)

    p = {"conv": [], "lstm": []}
    in_dim = num_features
    for _ in range(num_layers):
        p["conv"].append(dict(w1=w((in_dim, hidden_dim)), b1=w((hidden_dim,), 0.05),
                              w2=w((hidden_dim, hidden_dim)), b2=w((hidden_dim,), 0.05)))
        in_dim = hidden_dim
    for _ in range(2):   # forward / backward LSTM direction; gate order i, f, g, o
        p["lstm"].append(dict(wih=w((hidden_dim, 4 * hidden_lstm)),
                              whh=w((hidden_lstm, 4 * hidden_lstm)),
                              bih=w((4 * hidden_lstm,), 0.05),
                              bhh=w((4 * hidden_lstm,), 0.05)))
    p["watt"] = w((2 * hidden_lstm, 1))
    p["batt"] = w((1,), 0.05)
    p["wlin"] = w((hidden_dim, out_channels))
    p["blin"] = w((out_channels,), 0.05)
    p["wfc"] = w((out_channels, 1))
    p["bfc"] = w((1,), 0.05)
    return p


def _pack_params(p, *, hidden_dim, hidden_lstm):
    f32 = jnp.float32
    num_layers = len(p["conv"])

    def pad2(a, rows, cols):
        return jnp.zeros((rows, cols), f32).at[:a.shape[0], :a.shape[1]].set(a)

    packed = {}
    # Stacked, lane-padded GIN MLP weights (F_PAD == H_PAD so one stack works).
    w1s = jnp.zeros((num_layers, F_PAD, H_PAD), f32)
    b1s = jnp.zeros((num_layers, 1, H_PAD), f32)
    w2s = jnp.zeros((num_layers, H_PAD, H_PAD), f32)
    b2s = jnp.zeros((num_layers, 1, H_PAD), f32)
    for l, layer in enumerate(p["conv"]):
        w1s = w1s.at[l, :layer["w1"].shape[0], :layer["w1"].shape[1]].set(layer["w1"])
        b1s = b1s.at[l, 0, :layer["b1"].shape[0]].set(layer["b1"])
        w2s = w2s.at[l, :layer["w2"].shape[0], :layer["w2"].shape[1]].set(layer["w2"])
        b2s = b2s.at[l, 0, :layer["b2"].shape[0]].set(layer["b2"])
    packed.update(w1s=w1s, b1s=b1s, w2s=w2s, b2s=b2s)

    Hl = hidden_lstm
    packed["lstm"] = []
    for d in p["lstm"]:
        # Each gate is placed in its own 128-lane block; biases pre-summed.
        Wih = jnp.zeros((H_PAD, 4 * HL_PAD), f32)
        Whh = jnp.zeros((HL_PAD, 4 * HL_PAD), f32)
        B = jnp.zeros((1, 4 * HL_PAD), f32)
        for k in range(4):
            Wih = Wih.at[:hidden_dim, k * HL_PAD:k * HL_PAD + Hl].set(
                d["wih"][:, k * Hl:(k + 1) * Hl])
            Whh = Whh.at[:Hl, k * HL_PAD:k * HL_PAD + Hl].set(
                d["whh"][:, k * Hl:(k + 1) * Hl])
            B = B.at[0, k * HL_PAD:k * HL_PAD + Hl].set(
                d["bih"][k * Hl:(k + 1) * Hl] + d["bhh"][k * Hl:(k + 1) * Hl])
        packed["lstm"].append(dict(Wih=Wih, Whh=Whh, B=B))

    watt = jnp.zeros((1, 2 * HL_PAD), f32)
    watt = watt.at[0, :Hl].set(p["watt"][:Hl, 0])                   # forward half
    watt = watt.at[0, HL_PAD:HL_PAD + Hl].set(p["watt"][Hl:, 0])    # backward half
    packed["watt"] = watt
    packed["batt"] = p["batt"].reshape(1, 1).astype(f32)
    packed["wlin"] = pad2(p["wlin"], H_PAD, C_PAD)
    packed["blin"] = pad2(p["blin"][None, :], 1, C_PAD)
    packed["wfc"] = pad2(p["wfc"], C_PAD, O_PAD)
    packed["bfc"] = pad2(p["bfc"][None, :], 1, O_PAD)
    return packed


if __name__ == "__main__":
    # Module hyper-parameters (small, consistent with the PyTorch __init__).
    batch_size = 2
    n_nodes = 16
    num_features = 4
    out_channels = 6
    hidden_dim = 5
    num_layers = 3
    target_node_idx = 3
    hidden_lstm = (num_layers * hidden_dim) // 2   # = 7 (PyG JumpingKnowledge 'lstm')

    n_total = batch_size * n_nodes
    key = jax.random.PRNGKey(0)
    k_x, k_p = jax.random.split(key)

    # Node features.
    x = jax.random.normal(k_x, (n_total, num_features)).astype(jnp.float32)

    # Deterministic edge_index: bidirectional ring inside each graph.
    src, dst = [], []
    for g in range(batch_size):
        for k in range(n_nodes):
            a = g * n_nodes + k
            b = g * n_nodes + (k + 1) % n_nodes
            src += [a, b]
            dst += [b, a]
    edge_index = jnp.array([src, dst], dtype=jnp.int32)          # [2, E]

    true_params = _init_true_params(
        k_p, num_features=num_features, hidden_dim=hidden_dim,
        out_channels=out_channels, num_layers=num_layers, hidden_lstm=hidden_lstm)
    packed = _pack_params(true_params, hidden_dim=hidden_dim, hidden_lstm=hidden_lstm)

    out = regresor_gin_forward(
        x, edge_index, packed,
        batch_size=batch_size, n_nodes=n_nodes,
        num_features=num_features, target_node_idx=target_node_idx)
    out = jax.block_until_ready(out)
    assert out.shape == (batch_size,)
    print("KERNEL_OK")
</pallas_src>

<mosaic_0001>
module attributes {stable_mosaic.version = 11 : i64} {
  func.func @_gin_conv_kernel(%arg0: i32, %arg1: memref<1x16x16xbf16, #tpu.memory_space<vmem>>, %arg2: memref<1x16x128xbf16, #tpu.memory_space<vmem>>, %arg3: memref<3x128x128xf32, #tpu.memory_space<vmem>>, %arg4: memref<3x1x128xf32, #tpu.memory_space<vmem>>, %arg5: memref<3x128x128xf32, #tpu.memory_space<vmem>>, %arg6: memref<3x1x128xf32, #tpu.memory_space<vmem>>, %arg7: memref<1x3x8x128xf32, #tpu.memory_space<vmem>>) attributes {dimension_semantics = [#tpu.dimension_semantics<parallel>], iteration_bounds = array<i64: 2>, scalar_prefetch = 0 : i64, scratch_operands = 0 : i64, tpu.core_type = #tpu.core_type<tc>, window_params = [{transform_indices = @transform_0, window_bounds = array<i64: 1, 16, 16>}, {transform_indices = @transform_1, window_bounds = array<i64: 1, 16, 128>}, {pipeline_mode = #tpu.pipeline_mode<synchronous>, transform_indices = @transform_2, window_bounds = array<i64: 3, 128, 128>}, {pipeline_mode = #tpu.pipeline_mode<synchronous>, transform_indices = @transform_3, window_bounds = array<i64: 3, 1, 128>}, {pipeline_mode = #tpu.pipeline_mode<synchronous>, transform_indices = @transform_4, window_bounds = array<i64: 3, 128, 128>}, {pipeline_mode = #tpu.pipeline_mode<synchronous>, transform_indices = @transform_5, window_bounds = array<i64: 3, 1, 128>}, {transform_indices = @transform_6, window_bounds = array<i64: 1, 3, 8, 128>}]} {
    %c0 = arith.constant 0 : index
    %c0_0 = arith.constant 0 : index
    %c0_1 = arith.constant 0 : index
    %0 = vector.load %arg1[%c0, %c0_0, %c0_1] : memref<1x16x16xbf16, #tpu.memory_space<vmem>>, vector<1x16x16xbf16>
    %1 = vector.shape_cast %0 : vector<1x16x16xbf16> to vector<16x16xbf16>
    %c0_2 = arith.constant 0 : index
    %c0_3 = arith.constant 0 : index
    %c0_4 = arith.constant 0 : index
    %2 = vector.load %arg2[%c0_2, %c0_3, %c0_4] : memref<1x16x128xbf16, #tpu.memory_space<vmem>>, vector<1x16x128xbf16>
    %3 = vector.shape_cast %2 : vector<1x16x128xbf16> to vector<16x128xbf16>
    %cst = arith.constant dense<0.000000e+00> : vector<16x128xf32>
    %4 = tpu.matmul %1, %3, %cst {dimension_numbers = #tpu.dot_dimension_numbers<[1], [0], [0], [1], [0, 0, 1, 1], [], []>} : vector<16x16xbf16>, vector<16x128xbf16>, vector<16x128xf32> -> vector<16x128xf32>
    %c0_5 = arith.constant 0 : index
    %c0_6 = arith.constant 0 : index
    %c0_7 = arith.constant 0 : index
    %5 = vector.load %arg3[%c0_5, %c0_6, %c0_7] : memref<3x128x128xf32, #tpu.memory_space<vmem>>, vector<1x128x128xf32>
    %6 = vector.shape_cast %5 : vector<1x128x128xf32> to vector<128x128xf32>
    %cst_8 = arith.constant dense<0.000000e+00> : vector<16x128xf32>
    %7 = tpu.matmul %4, %6, %cst_8 {dimension_numbers = #tpu.dot_dimension_numbers<[1], [0], [0], [1], [0, 0, 1, 1], [], []>} : vector<16x128xf32>, vector<128x128xf32>, vector<16x128xf32> -> vector<16x128xf32>
    %c0_9 = arith.constant 0 : index
    %c0_10 = arith.constant 0 : index
    %c0_11 = arith.constant 0 : index
    %8 = vector.load %arg4[%c0_9, %c0_10, %c0_11] : memref<3x1x128xf32, #tpu.memory_space<vmem>>, vector<1x1x128xf32>
    %9 = vector.shape_cast %8 : vector<1x1x128xf32> to vector<1x128xf32>
    %10 = vector.broadcast %9 : vector<1x128xf32> to vector<16x128xf32>
    %11 = arith.addf %7, %10 : vector<16x128xf32>
    %cst_12 = arith.constant 0.000000e+00 : f32
    %12 = vector.broadcast %cst_12 : f32 to vector<16x128xf32>
    %13 = arith.cmpf ogt, %11, %12 : vector<16x128xf32>
    %cst_13 = arith.constant 0.00999999977 : f32
    %14 = vector.broadcast %cst_13 : f32 to vector<16x128xf32>
    %15 = arith.mulf %14, %11 : vector<16x128xf32>
    %16 = arith.select %13, %11, %15 : vector<16x128xi1>, vector<16x128xf32>
    %c0_14 = arith.constant 0 : index
    %c0_15 = arith.constant 0 : index
    %c0_16 = arith.constant 0 : index
    %17 = vector.load %arg5[%c0_14, %c0_15, %c0_16] : memref<3x128x128xf32, #tpu.memory_space<vmem>>, vector<1x128x128xf32>
    %18 = vector.shape_cast %17 : vector<1x128x128xf32> to vector<128x128xf32>
    %cst_17 = arith.constant dense<0.000000e+00> : vector<16x128xf32>
    %19 = tpu.matmul %16, %18, %cst_17 {dimension_numbers = #tpu.dot_dimension_numbers<[1], [0], [0], [1], [0, 0, 1, 1], [], []>} : vector<16x128xf32>, vector<128x128xf32>, vector<16x128xf32> -> vector<16x128xf32>
    %c0_18 = arith.constant 0 : index
    %c0_19 = arith.constant 0 : index
    %c0_20 = arith.constant 0 : index
    %20 = vector.load %arg6[%c0_18, %c0_19, %c0_20] : memref<3x1x128xf32, #tpu.memory_space<vmem>>, vector<1x1x128xf32>
    %21 = vector.shape_cast %20 : vector<1x1x128xf32> to vector<1x128xf32>
    %22 = vector.broadcast %21 : vector<1x128xf32> to vector<16x128xf32>
    %23 = arith.addf %19, %22 : vector<16x128xf32>
    %cst_21 = arith.constant 0.000000e+00 : f32
    %24 = vector.broadcast %cst_21 : f32 to vector<16x128xf32>
    %25 = arith.cmpf ogt, %23, %24 : vector<16x128xf32>
    %cst_22 = arith.constant 0.00999999977 : f32
    %26 = vector.broadcast %cst_22 : f32 to vector<16x128xf32>
    %27 = arith.mulf %26, %23 : vector<16x128xf32>
    %28 = arith.select %25, %23, %27 : vector<16x128xi1>, vector<16x128xf32>
    %29 = vector.extract_strided_slice %28 {offsets = [0, 0], sizes = [8, 128], strides = [1, 1]} : vector<16x128xf32> to vector<8x128xf32>
    %c0_23 = arith.constant 0 : index
    %c0_24 = arith.constant 0 : index
    %c0_25 = arith.constant 0 : index
    %c0_26 = arith.constant 0 : index
    %30 = vector.load %arg7[%c0_23, %c0_24, %c0_25, %c0_26] : memref<1x3x8x128xf32, #tpu.memory_space<vmem>>, vector<1x1x8x128xf32>
    %31 = vector.shape_cast %30 : vector<1x1x8x128xf32> to vector<8x128xf32>
    %32 = vector.shape_cast %29 : vector<8x128xf32> to vector<1x1x8x128xf32>
    tpu.vector_store %arg7[%c0_23, %c0_24, %c0_25, %c0_26], %32 {strides = array<i32>} : memref<1x3x8x128xf32, #tpu.memory_space<vmem>>, vector<1x1x8x128xf32>,
    %33 = arith.truncf %28 : vector<16x128xf32> to vector<16x128xbf16>
    %cst_27 = arith.constant dense<0.000000e+00> : vector<16x128xf32>
    %34 = tpu.matmul %1, %33, %cst_27 {dimension_numbers = #tpu.dot_dimension_numbers<[1], [0], [0], [1], [0, 0, 1, 1], [], []>} : vector<16x16xbf16>, vector<16x128xbf16>, vector<16x128xf32> -> vector<16x128xf32>
    %c1 = arith.constant 1 : index
    %c0_28 = arith.constant 0 : index
    %c0_29 = arith.constant 0 : index
    %35 = vector.load %arg3[%c1, %c0_28, %c0_29] : memref<3x128x128xf32, #tpu.memory_space<vmem>>, vector<1x128x128xf32>
    %36 = vector.shape_cast %35 : vector<1x128x128xf32> to vector<128x128xf32>
    %cst_30 = arith.constant dense<0.000000e+00> : vector<16x128xf32>
    %37 = tpu.matmul %34, %36, %cst_30 {dimension_numbers = #tpu.dot_dimension_numbers<[1], [0], [0], [1], [0, 0, 1, 1], [], []>} : vector<16x128xf32>, vector<128x128xf32>, vector<16x128xf32> -> vector<16x128xf32>
    %c1_31 = arith.constant 1 : index
    %c0_32 = arith.constant 0 : index
    %c0_33 = arith.constant 0 : index
    %38 = vector.load %arg4[%c1_31, %c0_32, %c0_33] : memref<3x1x128xf32, #tpu.memory_space<vmem>>, vector<1x1x128xf32>
    %39 = vector.shape_cast %38 : vector<1x1x128xf32> to vector<1x128xf32>
    %40 = vector.broadcast %39 : vector<1x128xf32> to vector<16x128xf32>
    %41 = arith.addf %37, %40 : vector<16x128xf32>
    %cst_34 = arith.constant 0.000000e+00 : f32
    %42 = vector.broadcast %cst_34 : f32 to vector<16x128xf32>
    %43 = arith.cmpf ogt, %41, %42 : vector<16x128xf32>
    %cst_35 = arith.constant 0.00999999977 : f32
    %44 = vector.broadcast %cst_35 : f32 to vector<16x128xf32>
    %45 = arith.mulf %44, %41 : vector<16x128xf32>
    %46 = arith.select %43, %41, %45 : vector<16x128xi1>, vector<16x128xf32>
    %c1_36 = arith.constant 1 : index
    %c0_37 = arith.constant 0 : index
    %c0_38 = arith.constant 0 : index
    %47 = vector.load %arg5[%c1_36, %c0_37, %c0_38] : memref<3x128x128xf32, #tpu.memory_space<vmem>>, vector<1x128x128xf32>
    %48 = vector.shape_cast %47 : vector<1x128x128xf32> to vector<128x128xf32>
    %cst_39 = arith.constant dense<0.000000e+00> : vector<16x128xf32>
    %49 = tpu.matmul %46, %48, %cst_39 {dimension_numbers = #tpu.dot_dimension_numbers<[1], [0], [0], [1], [0, 0, 1, 1], [], []>} : vector<16x128xf32>, vector<128x128xf32>, vector<16x128xf32> -> vector<16x128xf32>
    %c1_40 = arith.constant 1 : index
    %c0_41 = arith.constant 0 : index
    %c0_42 = arith.constant 0 : index
    %50 = vector.load %arg6[%c1_40, %c0_41, %c0_42] : memref<3x1x128xf32, #tpu.memory_space<vmem>>, vector<1x1x128xf32>
    %51 = vector.shape_cast %50 : vector<1x1x128xf32> to vector<1x128xf32>
    %52 = vector.broadcast %51 : vector<1x128xf32> to vector<16x128xf32>
    %53 = arith.addf %49, %52 : vector<16x128xf32>
    %cst_43 = arith.constant 0.000000e+00 : f32
    %54 = vector.broadcast %cst_43 : f32 to vector<16x128xf32>
    %55 = arith.cmpf ogt, %53, %54 : vector<16x128xf32>
    %cst_44 = arith.constant 0.00999999977 : f32
    %56 = vector.broadcast %cst_44 : f32 to vector<16x128xf32>
    %57 = arith.mulf %56, %53 : vector<16x128xf32>
    %58 = arith.select %55, %53, %57 : vector<16x128xi1>, vector<16x128xf32>
    %59 = vector.extract_strided_slice %58 {offsets = [0, 0], sizes = [8, 128], strides = [1, 1]} : vector<16x128xf32> to vector<8x128xf32>
    %c0_45 = arith.constant 0 : index
    %c1_46 = arith.constant 1 : index
    %c0_47 = arith.constant 0 : index
    %c0_48 = arith.constant 0 : index
    %60 = vector.load %arg7[%c0_45, %c1_46, %c0_47, %c0_48] : memref<1x3x8x128xf32, #tpu.memory_space<vmem>>, vector<1x1x8x128xf32>
    %61 = vector.shape_cast %60 : vector<1x1x8x128xf32> to vector<8x128xf32>
    %62 = vector.shape_cast %59 : vector<8x128xf32> to vector<1x1x8x128xf32>
    tpu.vector_store %arg7[%c0_45, %c1_46, %c0_47, %c0_48], %62 {strides = array<i32>} : memref<1x3x8x128xf32, #tpu.memory_space<vmem>>, vector<1x1x8x128xf32>,
    %63 = arith.truncf %58 : vector<16x128xf32> to vector<16x128xbf16>
    %64 = vector.extract_strided_slice %1 {offsets = [0, 0], sizes = [8, 16], strides = [1, 1]} : vector<16x16xbf16> to vector<8x16xbf16>
    %cst_49 = arith.constant dense<0.000000e+00> : vector<8x128xf32>
    %65 = tpu.matmul %64, %63, %cst_49 {dimension_numbers = #tpu.dot_dimension_numbers<[1], [0], [0], [1], [0, 0, 1, 1], [], []>} : vector<8x16xbf16>, vector<16x128xbf16>, vector<8x128xf32> -> vector<8x128xf32>
    %c2 = arith.constant 2 : index
    %c0_50 = arith.constant 0 : index
    %c0_51 = arith.constant 0 : index
    %66 = vector.load %arg3[%c2, %c0_50, %c0_51] : memref<3x128x128xf32, #tpu.memory_space<vmem>>, vector<1x128x128xf32>
    %67 = vector.shape_cast %66 : vector<1x128x128xf32> to vector<128x128xf32>
    %cst_52 = arith.constant dense<0.000000e+00> : vector<8x128xf32>
    %68 = tpu.matmul %65, %67, %cst_52 {dimension_numbers = #tpu.dot_dimension_numbers<[1], [0], [0], [1], [0, 0, 1, 1], [], []>} : vector<8x128xf32>, vector<128x128xf32>, vector<8x128xf32> -> vector<8x128xf32>
    %c2_53 = arith.constant 2 : index
    %c0_54 = arith.constant 0 : index
    %c0_55 = arith.constant 0 : index
    %69 = vector.load %arg4[%c2_53, %c0_54, %c0_55] : memref<3x1x128xf32, #tpu.memory_space<vmem>>, vector<1x1x128xf32>
    %70 = vector.shape_cast %69 : vector<1x1x128xf32> to vector<1x128xf32>
    %71 = vector.broadcast %70 : vector<1x128xf32> to vector<8x128xf32>
    %72 = arith.addf %68, %71 : vector<8x128xf32>
    %cst_56 = arith.constant 0.000000e+00 : f32
    %73 = vector.broadcast %cst_56 : f32 to vector<8x128xf32>
    %74 = arith.cmpf ogt, %72, %73 : vector<8x128xf32>
    %cst_57 = arith.constant 0.00999999977 : f32
    %75 = vector.broadcast %cst_57 : f32 to vector<8x128xf32>
    %76 = arith.mulf %75, %72 : vector<8x128xf32>
    %77 = arith.select %74, %72, %76 : vector<8x128xi1>, vector<8x128xf32>
    %c2_58 = arith.constant 2 : index
    %c0_59 = arith.constant 0 : index
    %c0_60 = arith.constant 0 : index
    %78 = vector.load %arg5[%c2_58, %c0_59, %c0_60] : memref<3x128x128xf32, #tpu.memory_space<vmem>>, vector<1x128x128xf32>
    %79 = vector.shape_cast %78 : vector<1x128x128xf32> to vector<128x128xf32>
    %cst_61 = arith.constant dense<0.000000e+00> : vector<8x128xf32>
    %80 = tpu.matmul %77, %79, %cst_61 {dimension_numbers = #tpu.dot_dimension_numbers<[1], [0], [0], [1], [0, 0, 1, 1], [], []>} : vector<8x128xf32>, vector<128x128xf32>, vector<8x128xf32> -> vector<8x128xf32>
    %c2_62 = arith.constant 2 : index
    %c0_63 = arith.constant 0 : index
    %c0_64 = arith.constant 0 : index
    %81 = vector.load %arg6[%c2_62, %c0_63, %c0_64] : memref<3x1x128xf32, #tpu.memory_space<vmem>>, vector<1x1x128xf32>
    %82 = vector.shape_cast %81 : vector<1x1x128xf32> to vector<1x128xf32>
    %83 = vector.broadcast %82 : vector<1x128xf32> to vector<8x128xf32>
    %84 = arith.addf %80, %83 : vector<8x128xf32>
    %cst_65 = arith.constant 0.000000e+00 : f32
    %85 = vector.broadcast %cst_65 : f32 to vector<8x128xf32>
    %86 = arith.cmpf ogt, %84, %85 : vector<8x128xf32>
    %cst_66 = arith.constant 0.00999999977 : f32
    %87 = vector.broadcast %cst_66 : f32 to vector<8x128xf32>
    %88 = arith.mulf %87, %84 : vector<8x128xf32>
    %89 = arith.select %86, %84, %88 : vector<8x128xi1>, vector<8x128xf32>
    %c0_67 = arith.constant 0 : index
    %c2_68 = arith.constant 2 : index
    %c0_69 = arith.constant 0 : index
    %c0_70 = arith.constant 0 : index
    %90 = vector.load %arg7[%c0_67, %c2_68, %c0_69, %c0_70] : memref<1x3x8x128xf32, #tpu.memory_space<vmem>>, vector<1x1x8x128xf32>
    %91 = vector.shape_cast %90 : vector<1x1x8x128xf32> to vector<8x128xf32>
    %92 = vector.shape_cast %89 : vector<8x128xf32> to vector<1x1x8x128xf32>
    tpu.vector_store %arg7[%c0_67, %c2_68, %c0_69, %c0_70], %92 {strides = array<i32>} : memref<1x3x8x128xf32, #tpu.memory_space<vmem>>, vector<1x1x8x128xf32>,
    return
  }
  func.func @transform_0(%arg0: i32) -> (i32, i32, i32) {
    %c0_i32 = arith.constant 0 : i32
    %c0_i32_0 = arith.constant 0 : i32
    %c0_i32_1 = arith.constant 0 : i32
    return %arg0, %c0_i32, %c0_i32_0 : i32, i32, i32
  }
  func.func @transform_1(%arg0: i32) -> (i32, i32, i32) {
    %c0_i32 = arith.constant 0 : i32
    %c0_i32_0 = arith.constant 0 : i32
    %c0_i32_1 = arith.constant 0 : i32
    return %arg0, %c0_i32, %c0_i32_0 : i32, i32, i32
  }
  func.func @transform_2(%arg0: i32) -> (i32, i32, i32) {
    %c0_i32 = arith.constant 0 : i32
    %c0_i32_0 = arith.constant 0 : i32
    %c0_i32_1 = arith.constant 0 : i32
    %c0_i32_2 = arith.constant 0 : i32
    return %c0_i32, %c0_i32_0, %c0_i32_1 : i32, i32, i32
  }
  func.func @transform_3(%arg0: i32) -> (i32, i32, i32) {
    %c0_i32 = arith.constant 0 : i32
    %c0_i32_0 = arith.constant 0 : i32
    %c0_i32_1 = arith.constant 0 : i32
    %c0_i32_2 = arith.constant 0 : i32
    return %c0_i32, %c0_i32_0, %c0_i32_1 : i32, i32, i32
  }
  func.func @transform_4(%arg0: i32) -> (i32, i32, i32) {
    %c0_i32 = arith.constant 0 : i32
    %c0_i32_0 = arith.constant 0 : i32
    %c0_i32_1 = arith.constant 0 : i32
    %c0_i32_2 = arith.constant 0 : i32
    return %c0_i32, %c0_i32_0, %c0_i32_1 : i32, i32, i32
  }
  func.func @transform_5(%arg0: i32) -> (i32, i32, i32) {
    %c0_i32 = arith.constant 0 : i32
    %c0_i32_0 = arith.constant 0 : i32
    %c0_i32_1 = arith.constant 0 : i32
    %c0_i32_2 = arith.constant 0 : i32
    return %c0_i32, %c0_i32_0, %c0_i32_1 : i32, i32, i32
  }
  func.func @transform_6(%arg0: i32) -> (i32, i32, i32, i32) {
    %c0_i32 = arith.constant 0 : i32
    %c0_i32_0 = arith.constant 0 : i32
    %c0_i32_1 = arith.constant 0 : i32
    %c0_i32_2 = arith.constant 0 : i32
    return %arg0, %c0_i32, %c0_i32_0, %c0_i32_1 : i32, i32, i32, i32
  }
}

</mosaic_0001>

<bundles_post_ra>
// kernel: tpu_custom_call.1
= control target key start
LH: loop header
LB: loop body
LE: loop exit
PB: predicated region body
PF: predicated region fallthrough
CT: control target
= control target key end

     0   :  { %s1492_s0 = inlined_call_operand.hbm [shape: bf16[2,16,16], index: 0, kind: input, shape index: {}]   ;;  %s1493_s1 = inlined_call_operand.hbm [shape: bf16[2,16,128], index: 1, kind: input, shape index: {}]   ;;  %s1494_s2 = inlined_call_operand.hbm [shape: f32[3,128,128], index: 2, kind: input, shape index: {}]   ;;  %s1495_s3 = inlined_call_operand.hbm [shape: f32[3,1,128], index: 3, kind: input, shape index: {}]   ;;  %s1496_s4 = inlined_call_operand.hbm [shape: f32[3,128,128], index: 4, kind: input, shape index: {}]   ;;  %s1497_s5 = inlined_call_operand.vmem [shape: f32[3,1,128], index: 5, kind: input, shape index: {}]   ;;  %s1498_s6 = inlined_call_operand.hbm [shape: f32[2,3,8,128], index: 6, kind: output, shape index: {}]  }
   0x1   :  { %1499 = sst [smem:[#allocation18_spill]] %s1492_s0 }
   0x2   :  { %1500 = sst [smem:[#allocation19_spill]] %s1494_s2 }
   0x3   :  { %1501 = sst [smem:[#allocation20_spill]] %s1495_s3 }
   0x4   :  { %1502 = sst [smem:[#allocation21_spill]] %s1496_s4 }
   0x5   :  { %11 = vsyncpa [#allocation3], 0 }
   0x6   :  { %13 = vsyncpa [#allocation3 + $0x1], 0 }
   0x7   :  { %14 = vsyncpa [#allocation6], 0 }
   0x8   :  { %16 = vsyncpa [#allocation6 + $0x1], 0 }
   0x9   :  { %17 = vsyncpa [#allocation9], 0 }
   0xa   :  { %18 = vsyncpa [#allocation4], 0 }
   0xb   :  { %20 = vsyncpa [#allocation4 + $0x1], 0  ;;  %s1278_s21 = smov 0   ;;  %s1280_s22 = smov 0  }
   0xc   :  { %s1282_s23 = smov 0   ;;  %s1284_s24 = smov 0  }
   0xd LB: > { %s1299_s25 = sadd.s32 4294967295, %s1230_s24   ;;  %s864_s26 = sadd.s32 4294967294, %s1230_s24   ;;  %s1230_s24 = sphi %s1284_s24, %s1519_s24   ;;  %s1226_s23 = sphi %s1282_s23, %s1518_s23   ;;  %s1222_s22 = sphi %s1280_s22, %s1517_s22   ;;  %s1218_s21 = sphi %s1278_s21, %s1516_s21  }
   0xe   : > { %p46_p0 = scmp.ne.s32.totalorder %s1222_s22, %s1218_s21  ;;  %p47_p1 = scmp.eq.s32.totalorder %s1299_s25, 0 }
   0xf   : > { %p180_p2 = scmp.eq.s32.totalorder %s1299_s25, 1  ;;  %p186_p3 = scmp.eq.s32.totalorder %s864_s26, 1 }
  0x10   : > { %p1308_p4 = por %p47_p1, %p46_p0  ;;  %p865_p5 = scmp.ge.s32.totalorder %s1230_s24, 1 }
  0x11   : > { %p1313_p6 = por %p186_p3, %p46_p0  ;;  %p193_p7 = scmp.lt.s32.totalorder %s1230_s24, 3 }
  0x12   : > { %s1505_s2 = sld [smem:[#allocation19_spill]]  ;;  %s1232_s9 = smov [#allocation7]  }
  0x13   : > { %p1321_p8 = pnand %p865_p5, %p193_p7  ;;  %s206_s10 = sshll.u32 %s1232_s9, 4  ;;  %s207_s10 = int_to_ptr.vmem [resolvable:$true] %s206_s10 }
  0x14   : > { %s1508_s3 = sld [smem:[#allocation20_spill]]  ;;  %s1233_s15 = smov 128  }
  0x15   : > { %p924_p9 = pneg %p1321_p8  ;;  %s1234_s16 = smov 8  }
  0x16   : > { %s1235_s17 = smov [#allocation8]   ;;  %s1236_s19 = smov 16  }
  0x17   : > { %p1329_p10 = pnand %p924_p9, %p47_p1  ;;  %s220_s18 = sshll.u32 %s1235_s17, 4  ;;  %s221_s18 = int_to_ptr.vmem [resolvable:$true] %s220_s18 }
  0x18   : > { %s204_s7 = sshll.u32 %s1505_s2, 4  ;;  %s1237_s20 = smov 1   ;;  %s205_s7 = int_to_ptr.hbm [resolvable:$true] %s204_s7 }
  0x19   : > { %927 = dma.hbm_to_vmem [thread:$0]  (!%p1329_p10), %s205_s7, 6144, %s207_s10, [#allocation6], %s1233_s15, %s1233_s15, %s1234_s16  }
  0x1a   : > { %s218_s14 = sshll.u32 %s1508_s3, 4  ;;  %s1509_s4 = sld [smem:[#allocation21_spill]]  ;;  %s219_s14 = int_to_ptr.hbm [resolvable:$true] %s218_s14 }
  0x1b   : > { %930 = dma.hbm_to_vmem [thread:$0]  (!%p1329_p10), %s219_s14, 48, %s221_s18, [#allocation9], %s1236_s19, %s1236_s19, %s1237_s20  }
  0x1c   : > { %s1238_s7 = smov [#allocation10]   ;;  %s1347_s10 = sadd.s32 1, %s1230_s24  }
  0x1d   : > { %s234_s9 = sshll.u32 %s1238_s7, 4  ;;  %s30_s12 = ssub.s32 %s1230_s24, %s1347_s10  ;;  %s235_s9 = int_to_ptr.vmem [resolvable:$true] %s234_s9 }
  0x1e   : > { %s33_s13 = sadd.s32 1, %s1226_s23  ;;  %p31_p12 = scmp.eq.s32.totalorder %s30_s12, 0 }
  0x1f   : > { %p40_p13 = scmp.ne.s32.totalorder %s1226_s23, %s1222_s22  ;;  %p41_p0 = scmp.eq.s32.totalorder %s1230_s24, 0 }
  0x20   : > { %s232_s30 = sshll.u32 %s1509_s4, 4  ;;  %p948_p3 = scmp.lt.s32.totalorder %s1230_s24, 2  ;;  %s233_s30 = int_to_ptr.hbm [resolvable:$true] %s232_s30 }
  0x21   : > { %933 = dma.hbm_to_vmem [thread:$0]  (!%p1329_p10), %s233_s30, 6144, %s235_s9, [#allocation9], %s1233_s15, %s1233_s15, %s1234_s16  }
  0x22   : > { %s1357_s14 = scalar_select %p31_p12, %s1226_s23, %s33_s13  }
  0x23   : > { %p42_p5 = por %p41_p0, %p40_p13  ;;  %p1361_p7 = por %p180_p2, %p40_p13 }
  0x24   : > { %1510 = sst [smem:[#allocation17_spill]] %s1357_s14  ;;  %s251_s11 = sand.u32 1, %s1226_s23  }
  0x25   : > { %s900_s15 = sshll.u32 %s1230_s24, 3  ;;  %s1367_s16 = sshll.u32 %s251_s11, 3 }
  0x26   : > { %s1512_s0 = sld [smem:[#allocation18_spill]]  ;;  %s255_s29 = scalar_lea.vmem [#allocation2], %s1367_s16 }
  0x27   : > { %s263_s30 = sshll.u32 %s255_s29, 4  ;;  %p1375_p9 = pnand %p948_p3, %p42_p5  ;;  %s264_s30 = int_to_ptr.vmem [resolvable:$true] %s263_s30 }
  0x28   : > { %s282_s13 = scalar_lea.hbm %s1493_s1, %s900_s15  ;;  %s252_s2 = scalar_lea.sflag [#allocation3], %s251_s11 }
  0x29   : > { %p1096_p10 = pneg %p1375_p9 }
  0x2c   : > { %s260_s20 = scalar_lea.hbm %s1512_s0, %s900_s15  ;;  %s1099_s3 = scalar_lea.hbm %s1512_s0, 16 }
  0x2d   : > { %s261_s26 = sshll.u32 %s260_s20, 4  ;;  %s262_s26 = int_to_ptr.hbm [resolvable:$true] %s261_s26 }
  0x2e   : > { %s1092_s18 = sshra.s32 %s262_s26, 4  ;;  %s1093_s18 = int_to_ptr.hbm [resolvable:$true] %s1092_s18 }
  0x2f   : > { %s1094_s19 = scalar_lea.hbm %s1093_s18, 8  ;;  %p1100_p0 = scmp.lt.s32.totalorder %s1093_s18, %s1512_s0 }
  0x30   : > { %p1095_p2 = scmp.ne.s32.totalorder %s1093_s18, %s1094_s19  ;;  %p1101_p3 = scmp.lt.s32.totalorder %s1099_s3, %s1094_s19 }
  0x32   : > { %p1097_p12 = pnand %p1096_p10, %p1095_p2  ;;  %p1102_p5 = por %p1101_p3, %p1100_p0 }
  0x34   : > { %p1098_p13 = pneg %p1097_p12 }
  0x36   : > { %p1103_p11 = pnand %p1102_p5, %p1098_p13 }
  0x38   : > { %1106 = shalt.err (!%p1103_p11)
}
  0x39   : > { %s1239_s11 = smov 64   ;;  %s1240_s15 = smov 4  }
  0x3a   : > { %937 = dma.hbm_to_vmem [thread:$0]  (!%p1375_p9), %s262_s26, 128, %s264_s30, %s252_s2, %s1239_s11, %s1239_s11, %s1240_s15  }
  0x3b   : > { %s283_s12 = sshll.u32 %s282_s13, 4  ;;  %s277_s14 = scalar_lea.vmem [#allocation5], %s1367_s16  ;;  %s284_s12 = int_to_ptr.hbm [resolvable:$true] %s283_s12 }
  0x3c   : > { %s285_s20 = sshll.u32 %s277_s14, 4  ;;  %s273_s29 = sand.u32 1, %s1230_s24   ;;  %s286_s20 = int_to_ptr.vmem [resolvable:$true] %s285_s20 }
  0x3d   : > { %s274_s4 = scalar_lea.sflag [#allocation6], %s273_s29  ;;  %s1122_s18 = sshra.s32 %s284_s12, 4  ;;  %s1123_s18 = int_to_ptr.hbm [resolvable:$true] %s1122_s18 }
  0x3e   : > { %s1124_s3 = scalar_lea.hbm %s1123_s18, 8  ;;  %s1129_s0 = scalar_lea.hbm %s1493_s1, 16 }
  0x3f   : > { %p1125_p2 = scmp.ne.s32.totalorder %s1123_s18, %s1124_s3  ;;  %p1130_p13 = scmp.lt.s32.totalorder %s1123_s18, %s1493_s1 }
  0x40   : > { %p1131_p0 = scmp.lt.s32.totalorder %s1129_s0, %s1124_s3 }
  0x41   : > { %p1127_p11 = pnand %p1125_p2, %p1096_p10 }
  0x42   : > { %p1132_p3 = por %p1131_p0, %p1130_p13 }
  0x43   : > { %p1128_p12 = pneg %p1127_p11 }
  0x45   : > { %p1133_p5 = pnand %p1132_p3, %p1128_p12 }
  0x47   : > { %1136 = shalt.err (!%p1133_p5)
}
  0x48   : > { %940 = dma.hbm_to_vmem [thread:$0]  (!%p1375_p9), %s284_s12, 128, %s286_s20, %s274_s4, %s1239_s11, %s1239_s11, %s1240_s15  }
  0x49   : > { %297 = sbr.rel (%p1321_p8) target bundleno = 1314 (0x522), region = 44  ;;  %s1411_s14 = sand.u32 (!%p1321_p8), 1, %s1222_s22  }
  0x4a   : > { %s877_s16 = sshll.u32 (!%p1321_p8), %s1411_s14, 3  ;;  %s300_s30 = scalar_lea.sflag (!%p1321_p8), [#allocation3], %s1411_s14 }
  0x4b   : > { %s1415_s13 = scalar_lea.vmem (!%p1321_p8), [#allocation2], %s877_s16 }
  0x4e   : > { %1197 = dma.done.wait (%p1308_p4), %s300_s30, 128  }
  0x4f   : > { %1199 = vsyncadd (%p1308_p4), %s300_s30, 4294967168  ;;  %s309_s0 = sand.u32 1, %s1299_s25   ;;  %s313_s7 = scalar_lea.vmem [#allocation5], %s877_s16 }
  0x50   : > { %s310_s8 = scalar_lea.sflag [#allocation6], %s309_s0 }
  0x51   : > { %1201 = dma.done.wait (%p1308_p4), %s310_s8, 128  }
  0x52   : > { %1203 = vsyncadd (%p1308_p4), %s310_s8, 4294967168 }
  0x53   : > { %1205 = dma.done.wait (%p47_p1), [#allocation6], 6144  }
  0x54   : > { %1207 = vsyncadd (%p47_p1), [#allocation6], 4294961152 }
  0x55   : > { %1209 = dma.done.wait (%p47_p1), [#allocation9], 6192  }
  0x56   : > { %1211 = vsyncadd (%p47_p1), [#allocation9], 4294961104  ;;  %v903_v0 = vld [vmem:[%s313_s7] sm:$0xff]  ;;  %v1435_v2 = vld [vmem:[%s1415_s13] sm:$0xff]  ;;  %vm379_vm0 = vcmask 130048   ;;  %s904_s15 = smul.u32 24, %s1411_s14 }
  0x57   : > { %v412_v1 = vld [vmem:[#allocation7 + $0x78] sm:$0xff]  ;;  %v411_v3 = vld [vmem:[#allocation7 + $0x70] sm:$0xff]  ;;  %390 = vmatpush.bf16.msra.mxu3 %v903_v0  ;;  %v410_v4 = vld [vmem:[#allocation7 + $0x68] sm:$0xff]  ;;  %s905_s4 = smul.u32 24, %s1299_s25  ;;  %s725_s25 = scalar_lea.sflag [#allocation4], %s1411_s14 }
  0x58   : > { %417 = vmatpush.msra.mxu1 %v412_v1  ;;  %v409_v5 = vld [vmem:[#allocation7 + $0x60] sm:$0xff]  ;;  %v408_v6 = vld [vmem:[#allocation7 + $0x58] sm:$0xff]  ;;  %v407_v7 = vld [vmem:[#allocation7 + $0x50] sm:$0xff]  ;;  %s1443_s12 = scalar_lea.vmem [#allocation11], %s904_s15  ;;  %s1172_s7 = scalar_lea.hbm %s1498_s6, 48 }
  0x59   : > { %v406_v8 = vld [vmem:[#allocation7 + $0x48] sm:$0xff]  ;;  %v405_v9 = vld [vmem:[#allocation7 + $0x40] sm:$0xff]  ;;  %v404_v10 = vld [vmem:[#allocation7 + $0x38] sm:$0xff]  ;;  %s736_s2 = scalar_lea.hbm %s1498_s6, %s905_s4  ;;  %s737_s26 = sshll.u32 %s1443_s12, 4  ;;  %s738_s26 = int_to_ptr.vmem [resolvable:$true] %s737_s26 }
  0x5a   : > { %418 = vmatpush.msra.mxu1 %v411_v3  ;;  %890 = vmatmul.msk.bf16.vlgmr.msra.gmra.mxu3 %vm379_vm0, %v1435_v2  ;;  %v403_v11 = vld [vmem:[#allocation7 + $0x30] sm:$0xff]  ;;  %v402_v12 = vld [vmem:[#allocation7 + $0x28] sm:$0xff]  ;;  %v401_v13 = vld [vmem:[#allocation7 + $0x20] sm:$0xff]  ;;  %s739_s16 = sshll.u32 %s736_s2, 4  ;;  %s740_s16 = int_to_ptr.hbm [resolvable:$true] %s739_s16 }
  0x5b   : > { %v400_v14 = vld [vmem:[#allocation7 + $0x18] sm:$0xff]  ;;  %v399_v15 = vld [vmem:[#allocation7 + $0x10] sm:$0xff]  ;;  %v398_v16 = vld [vmem:[#allocation7 + $0x8] sm:$0xff]  ;;  %s1166_s30 = sshra.s32 %s740_s16, 4  ;;  %s1167_s30 = int_to_ptr.hbm [resolvable:$true] %s1166_s30 }
  0x5c   : > { %419 = vmatpush.msra.mxu1 %v410_v4  ;;  %v397_v17 = vld [vmem:[#allocation7] sm:$0xff]  ;;  %v460_v19 = vld [vmem:[#allocation10 + $0x70] sm:$0xff]  ;;  %v459_v20 = vld [vmem:[#allocation10 + $0x68] sm:$0xff]  ;;  %p1173_p9 = scmp.lt.s32.totalorder %s1167_s30, %s1498_s6 }
  0x5d   : > { %v461_v18 = vld [vmem:[#allocation10 + $0x78] sm:$0xff]  ;;  %v458_v21 = vld [vmem:[#allocation10 + $0x60] sm:$0xff]  ;;  %v456_v23 = vld [vmem:[#allocation10 + $0x50] sm:$0xff] }
  0x5e   : > { %420 = vmatpush.msra.mxu1 %v409_v5  ;;  %466 = vmatpush.msra.mxu2 %v461_v18  ;;  %v457_v22 = vld [vmem:[#allocation10 + $0x58] sm:$0xff]  ;;  %v455_v24 = vld [vmem:[#allocation10 + $0x48] sm:$0xff]  ;;  %v454_v25 = vld [vmem:[#allocation10 + $0x40] sm:$0xff] }
  0x5f   : > { %v453_v26 = vld [vmem:[#allocation10 + $0x38] sm:$0xff]  ;;  %v452_v27 = vld [vmem:[#allocation10 + $0x30] sm:$0xff]  ;;  %v451_v28 = vld [vmem:[#allocation10 + $0x28] sm:$0xff] }
  0x60   : > { %421 = vmatpush.msra.mxu1 %v408_v6  ;;  %467 = vmatpush.msra.mxu2 %v460_v19  ;;  %v450_v29 = vld [vmem:[#allocation10 + $0x20] sm:$0xff]  ;;  %v449_v30 = vld [vmem:[#allocation10 + $0x18] sm:$0xff]  ;;  %v448_v33 = vld [vmem:[#allocation10 + $0x10] sm:$0xff] }
  0x61   : > { %v447_v34 = vld [vmem:[#allocation10 + $0x8] sm:$0xff]  ;;  %v446_v35 = vld [vmem:[#allocation10] sm:$0xff]  ;;  %v996_v36 = vld [vmem:[#allocation8] ss:$0 sm:$0xff] }
  0x62   : > { %422 = vmatpush.msra.mxu1 %v407_v7  ;;  %468 = vmatpush.msra.mxu2 %v459_v20  ;;  %v527_v45 = vld [vmem:[#allocation7 + $0xf8] sm:$0xff]  ;;  %v526_v46 = vld [vmem:[#allocation7 + $0xf0] sm:$0xff]  ;;  %v525_v47 = vld [vmem:[#allocation7 + $0xe8] sm:$0xff] }
  0x63   : > { %533 = vmatpush.msra.mxu0 %v527_v45  ;;  %v524_v48 = vld [vmem:[#allocation7 + $0xe0] sm:$0xff]  ;;  %v523_v49 = vld [vmem:[#allocation7 + $0xd8] sm:$0xff]  ;;  %v522_v50 = vld [vmem:[#allocation7 + $0xd0] sm:$0xff] }
  0x64   : > { %423 = vmatpush.msra.mxu1 %v406_v8  ;;  %469 = vmatpush.msra.mxu2 %v458_v21  ;;  %v997_v51 = vld [vmem:[%s1497_s5] ss:$0 sm:$0xff]  ;;  %v521_v52 = vld [vmem:[#allocation7 + $0xc8] sm:$0xff]  ;;  %v519_v56 = vld [vmem:[#allocation7 + $0xb8] sm:$0xff] }
  0x65   : > { %534 = vmatpush.msra.mxu0 %v526_v46  ;;  %v520_v53 = vld [vmem:[#allocation7 + $0xc0] sm:$0xff]  ;;  %v518_v58 = vld [vmem:[#allocation7 + $0xb0] sm:$0xff]  ;;  %v517_v60 = vld [vmem:[#allocation7 + $0xa8] sm:$0xff] }
  0x66   : > { %424 = vmatpush.msra.mxu1 %v405_v9  ;;  %470 = vmatpush.msra.mxu2 %v457_v22  ;;  %v516_v61 = vld [vmem:[#allocation7 + $0xa0] sm:$0xff]  ;;  %v515_v0 = vld [vmem:[#allocation7 + $0x98] sm:$0xff]  ;;  %v514_v3 = vld [vmem:[#allocation7 + $0x90] sm:$0xff] }
  0x67   : > { %535 = vmatpush.msra.mxu0 %v525_v47  ;;  %v513_v5 = vld [vmem:[#allocation7 + $0x88] sm:$0xff]  ;;  %v512_v7 = vld [vmem:[#allocation7 + $0x80] sm:$0xff]  ;;  %v577_v9 = vld [vmem:[#allocation10 + $0xf0] sm:$0xff] }
  0x68   : > { %425 = vmatpush.msra.mxu1 %v404_v10  ;;  %471 = vmatpush.msra.mxu2 %v456_v23  ;;  %v578_v8 = vld [vmem:[#allocation10 + $0xf8] sm:$0xff]  ;;  %v576_v10 = vld [vmem:[#allocation10 + $0xe8] sm:$0xff]  ;;  %v567_v18 = vld [vmem:[#allocation10 + $0xa0] sm:$0xff] }
  0x69   : > { %536 = vmatpush.msra.mxu0 %v524_v48  ;;  %v566_v19 = vld [vmem:[#allocation10 + $0x98] sm:$0xff]  ;;  %v565_v22 = vld [vmem:[#allocation10 + $0x90] sm:$0xff]  ;;  %v564_v23 = vld [vmem:[#allocation10 + $0x88] sm:$0xff] }
  0x6a   : > { %426 = vmatpush.msra.mxu1 %v403_v11  ;;  %472 = vmatpush.msra.mxu2 %v455_v24  ;;  %v575_v11 = vld [vmem:[#allocation10 + $0xe0] sm:$0xff]  ;;  %v640_v45 = vld [vmem:[#allocation7 + $0x138] sm:$0xff]  ;;  %v639_v47 = vld [vmem:[#allocation7 + $0x130] sm:$0xff] }
  0x6b   : > { %537 = vmatpush.msra.mxu0 %v523_v49  ;;  %v563_v24 = vld [vmem:[#allocation10 + $0x80] sm:$0xff] }
  0x6c   : > { %427 = vmatpush.msra.mxu1 %v402_v12  ;;  %473 = vmatpush.msra.mxu2 %v454_v25  ;;  %v574_v12 = vld [vmem:[#allocation10 + $0xd8] sm:$0xff]  ;;  %v638_v49 = vld [vmem:[#allocation7 + $0x128] sm:$0xff] }
  0x6d   : > { %538 = vmatpush.msra.mxu0 %v522_v50  ;;  %v998_v25 = vld [vmem:[#allocation8 + $0x1] ss:$0 sm:$0xff] }
  0x6e   : > { %428 = vmatpush.msra.mxu1 %v401_v13  ;;  %474 = vmatpush.msra.mxu2 %v453_v26  ;;  %v573_v13 = vld [vmem:[#allocation10 + $0xd0] sm:$0xff]  ;;  %v637_v50 = vld [vmem:[#allocation7 + $0x120] sm:$0xff] }
  0x6f   : > { %539 = vmatpush.msra.mxu0 %v521_v52 }
  0x70   : > { %429 = vmatpush.msra.mxu1 %v400_v14  ;;  %475 = vmatpush.msra.mxu2 %v452_v27  ;;  %v572_v14 = vld [vmem:[#allocation10 + $0xc8] sm:$0xff] }
  0x71   : > { %540 = vmatpush.msra.mxu0 %v520_v53  ;;  %v636_v53 = vld [vmem:[#allocation7 + $0x118] sm:$0xff] }
  0x72   : > { %430 = vmatpush.msra.mxu1 %v399_v15  ;;  %476 = vmatpush.msra.mxu2 %v451_v28  ;;  %v571_v15 = vld [vmem:[#allocation10 + $0xc0] sm:$0xff] }
  0x73   : > { %541 = vmatpush.msra.mxu0 %v519_v56 }
  0x74   : > { %431 = vmatpush.msra.mxu1 %v398_v16  ;;  %477 = vmatpush.msra.mxu2 %v450_v29  ;;  %v570_v16 = vld [vmem:[#allocation10 + $0xb8] sm:$0xff] }
  0x75   : > { %542 = vmatpush.msra.mxu0 %v518_v58  ;;  %v635_v58 = vld [vmem:[#allocation7 + $0x110] sm:$0xff] }
  0x76   : > { %432 = vmatpush.msra.mxu1 %v397_v17  ;;  %478 = vmatpush.msra.mxu2 %v449_v30  ;;  %v568_v17 = vld [vmem:[#allocation10 + $0xa8] sm:$0xff] }
  0x77   : > { %543 = vmatpush.msra.mxu0 %v517_v60  ;;  %v633_v60 = vld [vmem:[#allocation7 + $0x100] sm:$0xff] }
  0x78   : > { %479 = vmatpush.msra.mxu2 %v448_v33 }
  0x79   : > { %544 = vmatpush.msra.mxu0 %v516_v61  ;;  %v693_v61 = vld [vmem:[#allocation10 + $0x178] sm:$0xff] }
  0x7a   : > { %480 = vmatpush.msra.mxu2 %v447_v34  ;;  %v648_v34 = vld [vmem:[#allocation7 + $0x178] sm:$0xff] }
  0x7b   : > { %545 = vmatpush.msra.mxu0 %v515_v0  ;;  %v690_v0 = vld [vmem:[#allocation10 + $0x160] sm:$0xff] }
  0x7c   : > { %481 = vmatpush.msra.mxu2 %v446_v35  ;;  %v647_v35 = vld [vmem:[#allocation7 + $0x170] sm:$0xff] }
  0x7d   : > { %546 = vmatpush.msra.mxu0 %v514_v3  ;;  %v688_v3 = vld [vmem:[#allocation10 + $0x150] sm:$0xff] }
  0x7e   : > { %654 = vmatpush.msrb.mxu2 %v648_v34 }
  0x7f   : > { %547 = vmatpush.msra.mxu0 %v513_v5  ;;  %v686_v5 = vld [vmem:[#allocation10 + $0x140] sm:$0xff] }
  0x80   : > { %655 = vmatpush.msrb.mxu2 %v647_v35 }
  0x81   : > { %548 = vmatpush.msra.mxu0 %v512_v7  ;;  %v684_v7 = vld [vmem:[#allocation10 + $0x130] sm:$0xff] }
  0x83   : > { %699 = vmatpush.msrb.mxu0 %v693_v61 }
  0xdd   : > { %v392_v31 = vpop.f32.mrf.mxu3 }
  0xde   : > { %433 = vmatmul.f32.vlgmr.msra.gmra.mxu1 %v392_v31 }
  0xe5   : > { %v394_v32 = vpop.f32.mrf.mxu3 }
  0xe6   : > { %436 = vmatmul.f32.gmra.mxu1 %v394_v32 }
 0x15b   : > { %v434_v37 = vpop.f32.mrf.mxu1 }
 0x15c   : > { %v435_v38 = vadd.f32 %v996_v36, %v434_v37  ;;  %v645_v37 = vld [vmem:[#allocation7 + $0x160] sm:$0xff] }
 0x15e   : > { %vm440_vm1 = vcmp.gt.f32.partialorder %v435_v38, 0.0  ;;  %v442_v39 = vmul.f32 0.01, %v435_v38 }
 0x160   : > { %v444_v40 = vsel %vm440_vm1, %v435_v38, %v442_v39  ;;  %v644_v38 = vld [vmem:[#allocation7 + $0x158] sm:$0xff]  ;;  %v643_v39 = vld [vmem:[#allocation7 + $0x150] sm:$0xff] }
 0x161   : > { %482 = vmatmul.f32.vlgmr.msra.gmra.mxu2 %v444_v40  ;;  %v999_v40 = vld [vmem:[%s1497_s5 + $0x1] ss:$0 sm:$0xff] }
 0x163   : > { %v437_v41 = vpop.f32.mrf.mxu1 }
 0x164   : > { %v438_v42 = vadd.f32 %v996_v36, %v437_v41  ;;  %v646_v36 = vld [vmem:[#allocation7 + $0x168] sm:$0xff] }
 0x165   : > { %656 = vmatpush.msrb.mxu2 %v646_v36  ;;  %v642_v41 = vld [vmem:[#allocation7 + $0x148] sm:$0xff] }
 0x166   : > { %vm441_vm2 = vcmp.gt.f32.partialorder %v438_v42, 0.0  ;;  %v443_v43 = vmul.f32 0.01, %v438_v42 }
 0x167   : > { %657 = vmatpush.msrb.mxu2 %v645_v37 }
 0x168   : > { %v445_v44 = vsel %vm441_vm2, %v438_v42, %v443_v43  ;;  %v641_v42 = vld [vmem:[#allocation7 + $0x140] sm:$0xff] }
 0x169   : > { %485 = vmatmul.f32.gmra.mxu2 %v445_v44 }
 0x16a   : > { %658 = vmatpush.msrb.mxu2 %v644_v38 }
 0x16c   : > { %659 = vmatpush.msrb.mxu2 %v643_v39 }
 0x16e   : > { %660 = vmatpush.msrb.mxu2 %v642_v41 }
 0x170   : > { %661 = vmatpush.msrb.mxu2 %v641_v42 }
 0x172   : > { %662 = vmatpush.msrb.mxu2 %v640_v45 }
 0x174   : > { %663 = vmatpush.msrb.mxu2 %v639_v47 }
 0x176   : > { %664 = vmatpush.msrb.mxu2 %v638_v49 }
 0x178   : > { %665 = vmatpush.msrb.mxu2 %v637_v50 }
 0x17a   : > { %666 = vmatpush.msrb.mxu2 %v636_v53 }
 0x17c   : > { %667 = vmatpush.msrb.mxu2 %v635_v58 }
 0x1e4   : > { %v483_v54 = vpop.f32.mrf.mxu2 }
 0x1e5   : > { %v484_v55 = vadd.f32 %v997_v51, %v483_v54 }
 0x1e7   : > { %v491_v57 = vmul.f32 0.01, %v484_v55  ;;  %vm489_vm3 = vcmp.gt.f32.partialorder %v484_v55, 0.0 }
 0x1e9   : > { %v493_v59 = vsel %vm489_vm3, %v484_v55, %v491_v57  ;;  %v364_v57 = vld [vmem:[%s1415_s13] sm:$0xf]  ;;  %s1168_s13 = scalar_lea.hbm %s1167_s30, 24 }
 0x1ea   : > { %495 = vst [vmem:[%s1443_s12] sm:$0xff] %v493_v59  ;;  %p1169_p1 = scmp.ne.s32.totalorder %s1167_s30, %s1168_s13  ;;  %p1174_p10 = scmp.lt.s32.totalorder %s1172_s7, %s1168_s13 }
 0x1ec   : > { %v486_v62 = vpop.f32.mrf.mxu2  ;;  %p1170_p4 = pnand %p1169_p1, %p1361_p7  ;;  %p1175_p2 = por %p1174_p10, %p1173_p9 }
 0x1ed   : > { %v487_v63 = vadd.f32 %v997_v51, %v486_v62  ;;  %v692_v62 = vld [vmem:[#allocation10 + $0x170] sm:$0xff] }
 0x1ee   : > { %700 = vmatpush.msrb.mxu0 %v692_v62  ;;  %p1171_p8 = pneg %p1170_p4 }
 0x1ef   : > { %v492_v1 = vmul.f32 0.01, %v487_v63  ;;  %vm490_vm4 = vcmp.gt.f32.partialorder %v487_v63, 0.0 }
 0x1f0   : > { %p1176_p11 = pnand %p1175_p2, %p1171_p8 }
 0x1f1   : > { %v494_v4 = vsel %vm490_vm4, %v487_v63, %v492_v1  ;;  %v691_v63 = vld [vmem:[#allocation10 + $0x168] sm:$0xff]  ;;  %v689_v1 = vld [vmem:[#allocation10 + $0x158] sm:$0xff] }
 0x1f2   : > { %v496_v6 = vpack.c.bf16 %v494_v4, %v493_v59  ;;  %v634_v59 = vld [vmem:[#allocation7 + $0x108] sm:$0xff]  ;;  %701 = vmatpush.msrb.mxu0 %v691_v63 }
 0x1f3   : > { %668 = vmatpush.msrb.mxu2 %v634_v59  ;;  %v687_v4 = vld [vmem:[#allocation10 + $0x148] sm:$0xff] }
 0x1f4   : > { %504 = vmatpush.bf16.msrb.mxu3 %v496_v6  ;;  %702 = vmatpush.msrb.mxu0 %v690_v0  ;;  %v685_v6 = vld [vmem:[#allocation10 + $0x138] sm:$0xff] }
 0x1f5   : > { %669 = vmatpush.msrb.mxu2 %v633_v60 }
 0x1f6   : > { %703 = vmatpush.msrb.mxu0 %v689_v1 }
 0x1f7   : > { %891 = vmatmul.msk.bf16.vlgmr.msrb.gmra.mxu3 %vm379_vm0, %v1435_v2  ;;  %v569_v2 = vld [vmem:[#allocation10 + $0xb0] sm:$0xff] }
 0x1f8   : > { %584 = vmatpush.msra.mxu3 %v578_v8  ;;  %704 = vmatpush.msrb.mxu0 %v688_v3  ;;  %v683_v8 = vld [vmem:[#allocation10 + $0x128] sm:$0xff] }
 0x1fa   : > { %585 = vmatpush.msra.mxu3 %v577_v9  ;;  %705 = vmatpush.msrb.mxu0 %v687_v4  ;;  %v682_v9 = vld [vmem:[#allocation10 + $0x120] sm:$0xff] }
 0x1fc   : > { %586 = vmatpush.msra.mxu3 %v576_v10  ;;  %706 = vmatpush.msrb.mxu0 %v686_v5  ;;  %v681_v10 = vld [vmem:[#allocation10 + $0x118] sm:$0xff] }
 0x1fe   : > { %587 = vmatpush.msra.mxu3 %v575_v11  ;;  %707 = vmatpush.msrb.mxu0 %v685_v6 }
 0x200   : > { %588 = vmatpush.msra.mxu3 %v574_v12  ;;  %708 = vmatpush.msrb.mxu0 %v684_v7 }
 0x202   : > { %589 = vmatpush.msra.mxu3 %v573_v13  ;;  %709 = vmatpush.msrb.mxu0 %v683_v8  ;;  %v680_v13 = vld [vmem:[#allocation10 + $0x110] sm:$0xff] }
 0x204   : > { %590 = vmatpush.msra.mxu3 %v572_v14  ;;  %710 = vmatpush.msrb.mxu0 %v682_v9  ;;  %v679_v14 = vld [vmem:[#allocation10 + $0x108] sm:$0xff] }
 0x206   : > { %591 = vmatpush.msra.mxu3 %v571_v15  ;;  %711 = vmatpush.msrb.mxu0 %v681_v10  ;;  %v678_v15 = vld [vmem:[#allocation10 + $0x100] sm:$0xff] }
 0x208   : > { %592 = vmatpush.msra.mxu3 %v570_v16  ;;  %712 = vmatpush.msrb.mxu0 %v680_v13  ;;  %v1000_v16 = vld [vmem:[#allocation8 + $0x2] ss:$0 sm:$0xff] }
 0x20a   : > { %593 = vmatpush.msra.mxu3 %v569_v2  ;;  %713 = vmatpush.msrb.mxu0 %v679_v14 }
 0x20c   : > { %594 = vmatpush.msra.mxu3 %v568_v17  ;;  %714 = vmatpush.msrb.mxu0 %v678_v15 }
 0x20e   : > { %595 = vmatpush.msra.mxu3 %v567_v18 }
 0x210   : > { %596 = vmatpush.msra.mxu3 %v566_v19 }
 0x212   : > { %597 = vmatpush.msra.mxu3 %v565_v22 }
 0x214   : > { %598 = vmatpush.msra.mxu3 %v564_v23 }
 0x216   : > { %599 = vmatpush.msra.mxu3 %v563_v24 }
 0x27a   : > { %v506_v20 = vpop.f32.mrf.mxu3 }
 0x27b   : > { %549 = vmatmul.f32.vlgmr.msra.gmra.mxu0 %v506_v20  ;;  %v1001_v20 = vld [vmem:[%s1497_s5 + $0x2] ss:$0 sm:$0xff] }
 0x282   : > { %v508_v21 = vpop.f32.mrf.mxu3 }
 0x283   : > { %552 = vmatmul.f32.gmra.mxu0 %v508_v21 }
 0x2f8   : > { %v550_v26 = vpop.f32.mrf.mxu0 }
 0x2f9   : > { %v551_v27 = vadd.f32 %v998_v25, %v550_v26 }
 0x2fb   : > { %vm556_vm5 = vcmp.gt.f32.partialorder %v551_v27, 0.0  ;;  %v558_v28 = vmul.f32 0.01, %v551_v27 }
 0x2fd   : > { %v560_v29 = vsel %vm556_vm5, %v551_v27, %v558_v28 }
 0x2fe   : > { %600 = vmatmul.f32.vlgmr.msra.gmra.mxu3 %v560_v29 }
 0x300   : > { %v553_v30 = vpop.f32.mrf.mxu0 }
 0x301   : > { %v554_v31 = vadd.f32 %v998_v25, %v553_v30 }
 0x303   : > { %vm557_vm6 = vcmp.gt.f32.partialorder %v554_v31, 0.0  ;;  %v559_v32 = vmul.f32 0.01, %v554_v31 }
 0x305   : > { %v561_v33 = vsel %vm557_vm6, %v554_v31, %v559_v32 }
 0x306   : > { %603 = vmatmul.f32.gmra.mxu3 %v561_v33 }
 0x381   : > { %v601_v43 = vpop.f32.mrf.mxu3 }
 0x382   : > { %v602_v44 = vadd.f32 %v999_v40, %v601_v43 }
 0x384   : > { %v609_v46 = vmul.f32 0.01, %v602_v44  ;;  %vm607_vm7 = vcmp.gt.f32.partialorder %v602_v44, 0.0 }
 0x386   : > { %v611_v48 = vsel %vm607_vm7, %v602_v44, %v609_v46 }
 0x387   : > { %893 = vst [vmem:[%s1443_s12 + $0x8] sm:$0xff] %v611_v48 }
 0x389   : > { %v604_v51 = vpop.f32.mrf.mxu3 }
 0x38a   : > { %v605_v52 = vadd.f32 %v999_v40, %v604_v51 }
 0x38c   : > { %v610_v54 = vmul.f32 0.01, %v605_v52  ;;  %vm608_vm8 = vcmp.gt.f32.partialorder %v605_v52, 0.0 }
 0x38e   : > { %v612_v55 = vsel %vm608_vm8, %v605_v52, %v610_v54 }
 0x38f   : > { %v615_v56 = vpack.c.bf16 %v612_v55, %v611_v48 }
 0x391   : > { %626 = vmatpush.bf16.msrb.mxu1 %v615_v56 }
 0x394   : > { %894 = vmatmul.msk.bf16.vlgmr.msrb.gmra.mxu1 %vm379_vm0, %v364_v57 }
 0x411   : > { %v628_v11 = vpop.f32.mrf.mxu1 }
 0x412   : > { %670 = vmatmul.f32.vlgmr.msrb.gmra.mxu2 %v628_v11 }
 0x419   : > { %v630_v12 = vpop.f32.mrf.mxu1 }
 0x495   : > { %v671_v2 = vpop.f32.mrf.mxu2 }
 0x496   : > { %v672_v17 = vadd.f32 %v1000_v16, %v671_v2 }
 0x498   : > { %v675_v18 = vmul.f32 0.01, %v672_v17  ;;  %vm674_vm9 = vcmp.gt.f32.partialorder %v672_v17, 0.0 }
 0x49a   : > { %v676_v19 = vsel %vm674_vm9, %v672_v17, %v675_v18 }
 0x49b   : > { %715 = vmatmul.f32.vlgmr.msrb.gmra.mxu0 %v676_v19 }
 0x518   : > { %v716_v21 = vpop.f32.mrf.mxu0 }
 0x519   : > { %v717_v22 = vadd.f32 %v1001_v20, %v716_v21 }
 0x51b   : > { %vm719_vm10 = vcmp.gt.f32.partialorder %v717_v22, 0.0  ;;  %v720_v23 = vmul.f32 0.01, %v717_v22 }
 0x51d   : > { %v721_v24 = vsel %vm719_vm10, %v717_v22, %v720_v23 }
 0x51e   : > { %896 = vst [vmem:[%s1443_s12 + $0x10] sm:$0xff] %v721_v24 }
 0x51f   : > { %1179 = shalt.err (!%p1176_p11)
}
 0x520   : > { %s1241_s14 = smov 128   ;;  %s1242_s15 = smov 8  }
 0x521   : > { %922 = dma.vmem_to_hbm [thread:$0]  (%p1361_p7), %s738_s26, 384, %s740_s16, %s725_s25, %s1241_s14, %s1241_s14, %s1242_s15  }
 0x522 PF: > { %s754_s12 = sand.u32 1, %s1218_s21   ;;  %p1514_p12 = scmp.ge.s32.totalorder %s1230_s24, 2 }
 0x523   : > { %s755_s20 = scalar_lea.sflag [#allocation4], %s754_s12 }
 0x524   : > { %p942_p13 = pnand %p1514_p12, %p1313_p6 }
 0x526   : > { %p943_p0 = pneg %p942_p13 }
 0x528   : > { %1213 = dma.done.wait (%p943_p0), %s755_s20, 384  }
 0x529   : > { %1215 = vsyncadd (%p943_p0), %s755_s20, 4294966912  ;;  %s1515_s29 = sld [smem:[#allocation17_spill]]  ;;  %p23_p3 = scmp.ge.s32.totalorder %s1347_s10, 4  }
 0x52a   : > { %s1516_s21 = smov %s1222_s22  ;;  %s1517_s22 = smov %s1226_s23 }
 0x52b   : > { %s1519_s24 = smov %s1347_s10  ;;  %25 = sbr.rel (!%p23_p3) target bundleno = 13 (0xd), region = 124 }
 0x52f   : > { %s1518_s23 = smov %s1515_s29 }
 0x530   :  { %761 = vsyncpa [#allocation3], 1 }
 0x531   :  { %763 = vsyncpa [#allocation3 + $0x1], 1 }
 0x532   :  { %764 = vsyncpa [#allocation6], 1 }
 0x533   :  { %766 = vsyncpa [#allocation6 + $0x1], 1 }
 0x534   :  { %767 = vsyncpa [#allocation9], 1 }
 0x535   :  { %768 = vsyncpa [#allocation4], 1 }
 0x536   :  { %770 = vsyncpa [#allocation4 + $0x1], 1 }

</bundles_post_ra>
